<compile_context>
chip_gen: v6e
topology: v6e:2x2x1
jax: 0.10.0
libtpu: 0.0.40
codegen_flags: <defaults>
</compile_context>

<pallas_src>
import functools

import jax
import jax.numpy as jnp
from jax.experimental import pallas as pl
from jax.experimental.pallas import tpu as pltpu


def _univemb_kernel(with_res, with_image, softpos, res_mul, image_mul,
                    emit_xout, *refs):
    """Fused elementwise (res/image) + 1x1-conv (matmul + bias) kernel.

    refs = (x_ref, [res_ref], [img_ref], w_ref, b_ref, [xout_ref], y_ref)
    Data tiles are (1, Cin, t_hw) (spatial on lanes, channels on sublanes),
    w is (Cout, Cin), b is (Cout, 1), y tile is (1, Cout, t_hw).
    """
    idx = 0
    x_ref = refs[idx]; idx += 1
    res_ref = None
    img_ref = None
    if with_res:
        res_ref = refs[idx]; idx += 1
    if with_image:
        img_ref = refs[idx]; idx += 1
    w_ref = refs[idx]; idx += 1
    b_ref = refs[idx]; idx += 1
    xout_ref = None
    if emit_xout:
        xout_ref = refs[idx]; idx += 1
    y_ref = refs[idx]

    xv = x_ref[0].astype(jnp.float32)            # (Cin, t_hw)

    if with_res:
        r = res_ref[0].astype(jnp.float32)
        if softpos:
            # torch.softmax(res, dim=1): channel dim == sublane axis here
            # (cross-sublane reduction, routed through the XLU).
            r_max = jnp.max(r, axis=0, keepdims=True)
            r_exp = jnp.exp(r - r_max)
            r = r_exp / jnp.sum(r_exp, axis=0, keepdims=True)
        xv = xv * r if res_mul else xv + r

    if with_image:
        im = img_ref[0].astype(jnp.float32)
        xv = xv * im if image_mul else xv + im

    if emit_xout:
        # Only emitted when x was actually modified by res/image.
        xout_ref[0] = xv.astype(xout_ref.dtype)

    # SimpleDecoder depth=1 -> 1x1 Conv2d == (Cout, Cin) @ (Cin, t_hw) + bias.
    y = jnp.dot(w_ref[...], xv, preferred_element_type=jnp.float32) + b_ref[...]
    y_ref[0] = y.astype(y_ref.dtype)


class UnivEmbPallas:
    """Pallas implementation of UnivEmb (default config, full=False path)."""

    def __init__(self, out_channels, n_channels_embedding=32, mul=False,
                 softpos=False, image_operator='mul', seed=0):
        self.cin = n_channels_embedding     # in_dec = encoder.embedding_dim
        self.cout = out_channels
        self.mul = mul
        self.softpos = softpos
        self.image_mul = (image_operator == 'mul')

        # Deterministic synthetic parameters for the decoder's 1x1 conv
        # (nn.Conv2d(in_dec, out_channels, 1), bias=True by default).
        kw, kb = jax.random.split(jax.random.PRNGKey(seed))
        bound = 1.0 / float(self.cin) ** 0.5
        # Stored as (Cout, Cin) so the kernel does W @ X directly
        # (spatial on the lane axis).
        self.w = jax.random.uniform(kw, (self.cout, self.cin),
                                    minval=-bound, maxval=bound,
                                    dtype=jnp.float32)
        self.b = jax.random.uniform(kb, (self.cout, 1),
                                    minval=-bound, maxval=bound,
                                    dtype=jnp.float32)

    def __call__(self, x, full=False, res=None, image=None):
        if full:
            # TODO(synk): DUNet encoder (full=True) not implemented in Pallas.
            raise NotImplementedError("full=True (DUNet encoder) not implemented")

        n, c, h, w = x.shape
        assert c == self.cin, f"expected {self.cin} channels, got {c}"
        hw = h * w

        # Free, contiguous reshape NCHW -> (N, C, H*W); no transposes.
        x3 = x.reshape(n, c, hw)

        with_res = res is not None
        with_image = image is not None
        emit_xout = with_res or with_image

        inputs = [x3]
        if with_res:
            inputs.append(res.reshape(n, c, hw))
        if with_image:
            inputs.append(image.reshape(n, c, hw))
        inputs += [self.w, self.b]

        # Spatial tile on the 128-lane axis.  Large tiles amortize per-step
        # overhead; the cap keeps double-buffered VMEM usage a few MiB at
        # most, safely inside the scoped VMEM limit on v5e/v6e/v7x.
        if hw % 128 == 0:
            t_hw = min(hw, 4096)
        else:
            # Last block dim must be a multiple of 128 or span the full dim.
            t_hw = hw
        grid = (n, pl.cdiv(hw, t_hw))

        data_spec = pl.BlockSpec((1, self.cin, t_hw), lambda b, s: (b, 0, s))
        in_specs = [data_spec]
        if with_res:
            in_specs.append(pl.BlockSpec((1, self.cin, t_hw), lambda b, s: (b, 0, s)))
        if with_image:
            in_specs.append(pl.BlockSpec((1, self.cin, t_hw), lambda b, s: (b, 0, s)))
        in_specs += [
            pl.BlockSpec((self.cout, self.cin), lambda b, s: (0, 0)),   # W (resident)
            pl.BlockSpec((self.cout, 1), lambda b, s: (0, 0)),          # bias (resident)
        ]

        out_specs = []
        out_shape = []
        if emit_xout:
            out_specs.append(pl.BlockSpec((1, self.cin, t_hw), lambda b, s: (b, 0, s)))
            out_shape.append(jax.ShapeDtypeStruct((n, self.cin, hw), x.dtype))
        out_specs.append(pl.BlockSpec((1, self.cout, t_hw), lambda b, s: (b, 0, s)))
        out_shape.append(jax.ShapeDtypeStruct((n, self.cout, hw), x.dtype))

        kernel = functools.partial(
            _univemb_kernel, with_res, with_image,
            self.softpos, self.mul, self.image_mul, emit_xout)

        itemsize = x.dtype.itemsize
        n_data_in = (1 + int(with_res) + int(with_image)) * n * self.cin * hw
        bytes_accessed = (
            n_data_in * itemsize
            + (self.cout * self.cin + self.cout) * 4
            + (int(emit_xout) * n * self.cin * hw + n * self.cout * hw) * itemsize)
        cost = pl.CostEstimate(
            flops=2 * n * hw * self.cin * self.cout,
            transcendentals=(n * hw * self.cin) if (with_res and self.softpos) else 0,
            bytes_accessed=int(bytes_accessed))

        outs = pl.pallas_call(
            kernel,
            out_shape=out_shape,
            grid_spec=pltpu.PrefetchScalarGridSpec(
                num_scalar_prefetch=0,
                grid=grid,
                in_specs=in_specs,
                out_specs=out_specs,
            ),
            compiler_params=pltpu.CompilerParams(
                dimension_semantics=("parallel", "parallel")),
            cost_estimate=cost,
        )(*inputs)

        if emit_xout:
            xout3, y3 = outs
            x_out = xout3.reshape(n, self.cin, h, w)
        else:
            y3 = outs[0] if isinstance(outs, (tuple, list)) else outs
            x_out = x  # unmodified: skip the redundant re-write of x
        y_out = y3.reshape(n, self.cout, h, w)
        return x_out, y_out


def _reference(model, x, res=None, image=None):
    """Pure-JAX reference of UnivEmb.classical_forward (full=False), NCHW."""
    xv = x.astype(jnp.float32)
    if res is not None:
        r = res.astype(jnp.float32)
        if model.softpos:
            r = jax.nn.softmax(r, axis=1)
        xv = xv * r if model.mul else xv + r
    if image is not None:
        im = image.astype(jnp.float32)
        xv = xv * im if model.image_mul else xv + im
    # 1x1 conv: weight stored (Cout, Cin).
    y = jnp.einsum('nchw,oc->nohw', xv, model.w) + model.b[:, 0][None, :, None, None]
    return xv.astype(x.dtype), y.astype(x.dtype)


if __name__ == "__main__":
    key = jax.random.PRNGKey(0)
    kx, kr, ki, kx2, kr2 = jax.random.split(key, 5)

    N, C_EMB, H, W = 2, 32, 16, 16   # x is the precomputed embedding (full=False)
    OUT_CHANNELS = 8

    x = jax.random.normal(kx, (N, C_EMB, H, W), dtype=jnp.float32)
    res = jax.random.normal(kr, (N, C_EMB, H, W), dtype=jnp.float32)
    image = jax.random.normal(ki, (N, C_EMB, H, W), dtype=jnp.float32)

    model = UnivEmbPallas(out_channels=OUT_CHANNELS, n_channels_embedding=C_EMB,
                          mul=False, softpos=False, image_operator='mul', seed=0)

    # 1) Default forward path: forward(x) -> (x, decoder(x)).  x is returned
    #    unchanged (kernel only produces the decoder output).
    x_out, y_out = model(x)
    jax.block_until_ready((x_out, y_out))
    x_ref, y_ref = _reference(model, x)
    assert jnp.allclose(x_out, x_ref, atol=1e-5, rtol=1e-5)
    assert jnp.allclose(y_out, y_ref, atol=1e-4, rtol=1e-4)

    # 2) res (add) and image (mul) fused into the kernel.
    x_out2, y_out2 = model(x, res=res, image=image)
    jax.block_until_ready((x_out2, y_out2))
    x_ref2, y_ref2 = _reference(model, x, res=res, image=image)
    assert jnp.allclose(x_out2, x_ref2, atol=1e-5, rtol=1e-5)
    assert jnp.allclose(y_out2, y_ref2, atol=1e-4, rtol=1e-4)

    # 3) softpos + mul variant, with a spatial size that is NOT a multiple of
    #    128 (exercises the full-extent spatial block and the cross-sublane
    #    softmax path).
    model_sp = UnivEmbPallas(out_channels=OUT_CHANNELS, n_channels_embedding=C_EMB,
                             mul=True, softpos=True, image_operator='mul', seed=1)
    x_s = jax.random.normal(kx2, (1, C_EMB, 12, 12), dtype=jnp.float32)
    res_s = jax.random.normal(kr2, (1, C_EMB, 12, 12), dtype=jnp.float32)
    x_out3, y_out3 = model_sp(x_s, res=res_s)
    jax.block_until_ready((x_out3, y_out3))
    x_ref3, y_ref3 = _reference(model_sp, x_s, res=res_s)
    assert jnp.allclose(x_out3, x_ref3, atol=1e-5, rtol=1e-5)
    assert jnp.allclose(y_out3, y_ref3, atol=1e-4, rtol=1e-4)

    print("KERNEL_OK")
</pallas_src>

<mosaic_0001>
module attributes {stable_mosaic.version = 11 : i64} {
  func.func @_univemb_kernel(%arg0: i32, %arg1: i32, %arg2: memref<1x32x256xf32, #tpu.memory_space<vmem>>, %arg3: memref<8x32xf32, #tpu.memory_space<vmem>>, %arg4: memref<8x1xf32, #tpu.memory_space<vmem>>, %arg5: memref<1x8x256xf32, #tpu.memory_space<vmem>>) attributes {dimension_semantics = [#tpu.dimension_semantics<parallel>, #tpu.dimension_semantics<parallel>], iteration_bounds = array<i64: 2, 1>, scalar_prefetch = 0 : i64, scratch_operands = 0 : i64, tpu.core_type = #tpu.core_type<tc>, window_params = [{transform_indices = @transform_0, window_bounds = array<i64: 1, 32, 256>}, {pipeline_mode = #tpu.pipeline_mode<synchronous>, transform_indices = @transform_1, window_bounds = array<i64: 8, 32>}, {pipeline_mode = #tpu.pipeline_mode<synchronous>, transform_indices = @transform_2, window_bounds = array<i64: 8, 1>}, {transform_indices = @transform_3, window_bounds = array<i64: 1, 8, 256>}]} {
    %c0 = arith.constant 0 : index
    %c0_0 = arith.constant 0 : index
    %c0_1 = arith.constant 0 : index
    %0 = vector.load %arg2[%c0, %c0_0, %c0_1] : memref<1x32x256xf32, #tpu.memory_space<vmem>>, vector<1x32x256xf32>
    %1 = vector.shape_cast %0 : vector<1x32x256xf32> to vector<32x256xf32>
    %c0_2 = arith.constant 0 : index
    %c0_3 = arith.constant 0 : index
    %2 = vector.load %arg3[%c0_2, %c0_3] : memref<8x32xf32, #tpu.memory_space<vmem>>, vector<8x32xf32>
    %cst = arith.constant dense<0.000000e+00> : vector<8x256xf32>
    %3 = tpu.matmul %2, %1, %cst {dimension_numbers = #tpu.dot_dimension_numbers<[1], [0], [0], [1], [0, 0, 1, 1], [], []>} : vector<8x32xf32>, vector<32x256xf32>, vector<8x256xf32> -> vector<8x256xf32>
    %c0_4 = arith.constant 0 : index
    %c0_5 = arith.constant 0 : index
    %4 = vector.load %arg4[%c0_4, %c0_5] : memref<8x1xf32, #tpu.memory_space<vmem>>, vector<8x1xf32>
    %5 = vector.broadcast %4 : vector<8x1xf32> to vector<8x256xf32>
    %6 = arith.addf %3, %5 : vector<8x256xf32>
    %c0_6 = arith.constant 0 : index
    %c0_7 = arith.constant 0 : index
    %c0_8 = arith.constant 0 : index
    %7 = vector.load %arg5[%c0_6, %c0_7, %c0_8] : memref<1x8x256xf32, #tpu.memory_space<vmem>>, vector<1x8x256xf32>
    %8 = vector.shape_cast %7 : vector<1x8x256xf32> to vector<8x256xf32>
    %9 = vector.shape_cast %6 : vector<8x256xf32> to vector<1x8x256xf32>
    tpu.vector_store %arg5[%c0_6, %c0_7, %c0_8], %9 {strides = array<i32>} : memref<1x8x256xf32, #tpu.memory_space<vmem>>, vector<1x8x256xf32>,
    return
  }
  func.func @transform_0(%arg0: i32, %arg1: i32) -> (i32, i32, i32) {
    %c0_i32 = arith.constant 0 : i32
    %c0_i32_0 = arith.constant 0 : i32
    return %arg0, %c0_i32, %arg1 : i32, i32, i32
  }
  func.func @transform_1(%arg0: i32, %arg1: i32) -> (i32, i32) {
    %c0_i32 = arith.constant 0 : i32
    %c0_i32_0 = arith.constant 0 : i32
    %c0_i32_1 = arith.constant 0 : i32
    return %c0_i32, %c0_i32_0 : i32, i32
  }
  func.func @transform_2(%arg0: i32, %arg1: i32) -> (i32, i32) {
    %c0_i32 = arith.constant 0 : i32
    %c0_i32_0 = arith.constant 0 : i32
    %c0_i32_1 = arith.constant 0 : i32
    return %c0_i32, %c0_i32_0 : i32, i32
  }
  func.func @transform_3(%arg0: i32, %arg1: i32) -> (i32, i32, i32) {
    %c0_i32 = arith.constant 0 : i32
    %c0_i32_0 = arith.constant 0 : i32
    return %arg0, %c0_i32, %arg1 : i32, i32, i32
  }
}

</mosaic_0001>

<bundles_post_ra>
// kernel: tpu_custom_call.1
= control target key start
LH: loop header
LB: loop body
LE: loop exit
PB: predicated region body
PF: predicated region fallthrough
CT: control target
= control target key end

     0   :  { %8 = vsyncpa [#allocation3], 0  ;;  %s762_s0 = inlined_call_operand.hbm [shape: f32[2,32,256], index: 0, kind: input, shape index: {}]   ;;  %s763_s1 = inlined_call_operand.vmem [shape: f32[8,32], index: 1, kind: input, shape index: {}]   ;;  %s764_s2 = inlined_call_operand.vmem [shape: f32[8,1], index: 2, kind: input, shape index: {}]   ;;  %s765_s3 = inlined_call_operand.hbm [shape: f32[2,8,256], index: 3, kind: output, shape index: {}]  }
   0x1   :  { %10 = vsyncpa [#allocation3 + $0x1], 0 }
   0x2   :  { %11 = vsyncpa [#allocation4], 0 }
   0x3   :  { %13 = vsyncpa [#allocation4 + $0x1], 0  ;;  %s623_s12 = smov 0   ;;  %s625_s13 = smov 0  }
   0x4   :  { %s627_s14 = smov 0   ;;  %s629_s15 = smov 0  }
   0x5   :  { %s631_s16 = smov 0   ;;  %s633_s17 = smov 0  }
   0x6 LB: > { %s402_s18 = sadd.s32 4294967295, %s595_s17   ;;  %s403_s19 = sadd.s32 4294967294, %s595_s17   ;;  %s595_s17 = sphi %s633_s17, %s19_s17   ;;  %s591_s16 = sphi %s631_s16, %s776_s16   ;;  %s587_s15 = sphi %s629_s15, %s775_s15   ;;  %s583_s14 = sphi %s627_s14, %s774_s14   ;;  %s579_s13 = sphi %s625_s13, %s773_s13   ;;  %s575_s12 = sphi %s623_s12, %s772_s12  }
   0x7   : > { %s31_s20 = sadd.s32 1, %s591_s16  ;;  %s40_s21 = sadd.s32 1, %s583_s14 }
   0x8   : > { %p33_p0 = scmp.ge.s32.totalorder %s31_s20, 2  ;;  %p47_p1 = scmp.ne.s32.totalorder %s583_s14, %s579_s13 }
   0x9   : > { %p48_p2 = scmp.eq.s32.totalorder %s595_s17, 0  ;;  %p53_p3 = scmp.ne.s32.totalorder %s579_s13, %s575_s12 }
   0xa   : > { %s778_s20 = smov (%p33_p0, %s31_s20), 0  ;;  %p54_p5 = scmp.eq.s32.totalorder %s402_s18, 0 }
   0xb   : > { %p664_p4 = por %p48_p2, %p47_p1  ;;  %s35_s23 = ssub.s32 %s591_s16, %s778_s20 }
   0xc   : > { %p121_p6 = scmp.eq.s32.totalorder %s402_s18, 1  ;;  %p38_p7 = scmp.eq.s32.totalorder %s35_s23, 0 }
   0xd   : > { %p670_p8 = por %p54_p5, %p53_p3  ;;  %p127_p10 = scmp.eq.s32.totalorder %s403_s19, 1 }
   0xe   : > { %p674_p9 = por %p121_p6, %p47_p1  ;;  %p432_p13 = scmp.lt.s32.totalorder %s595_s17, 2 }
   0xf   : > { %s679_s26 = scalar_select %p38_p7, %s583_s14, %s40_s21  }
  0x10   : > { %p681_p11 = por %p127_p10, %p53_p3  ;;  %s153_s28 = sand.u32 1, %s583_s14  }
  0x11   : > { %s406_s29 = sshll.u32 %s153_s28, 6  ;;  %s418_s30 = sshll.u32 %s591_s16, 10 }
  0x12   : > { %s165_s6 = scalar_lea.hbm %s762_s0, %s418_s30  ;;  %s157_s7 = scalar_lea.vmem [#allocation2], %s406_s29 }
  0x13   : > { %s166_s8 = sshll.u32 %s157_s7, 4  ;;  %p694_p0 = pnand %p432_p13, %p664_p4  ;;  %s167_s8 = int_to_ptr.vmem [resolvable:$true] %s166_s8 }
  0x14   : > { %p409_p1 = scmp.ge.s32.totalorder %s595_s17, 1  ;;  %s154_s10 = scalar_lea.sflag [#allocation3], %s153_s28 }
  0x15   : > { %p489_p2 = pneg %p694_p0  ;;  %s500_s11 = scalar_lea.vmem %s167_s8, 1024 }
  0x16   : > { %p501_p3 = scmp.ne.s32.totalorder %s167_s8, %s500_s11  ;;  %s597_s18 = smov [#allocation2]  }
  0x17   : > { %s505_s19 = sshll.u32 %s597_s18, 4  ;;  %s506_s19 = int_to_ptr.vmem [resolvable:$false] %s505_s19 }
  0x18   : > { %p503_p5 = pnand %p501_p3, %p489_p2  ;;  %s507_s21 = scalar_lea.vmem %s506_s19, 2048 }
  0x19   : > { %p508_p7 = scmp.lt.s32.totalorder %s167_s8, %s506_s19  ;;  %p509_p10 = scmp.lt.s32.totalorder %s507_s21, %s500_s11 }
  0x1a   : > { %p504_p6 = pneg %p503_p5 }
  0x1b   : > { %p510_p12 = por %p509_p10, %p508_p7 }
  0x1d   : > { %p511_p4 = pnand %p510_p12, %p504_p6 }
  0x1f   : > { %514 = shalt.err (!%p511_p4)
}
  0x20   : > { %s598_s22 = smov 256   ;;  %s599_s23 = smov 16  }
  0x21   : > { %427 = dma.hbm_to_vmem [thread:$0]  (!%p694_p0), %s165_s6, 1024, %s167_s8, %s154_s10, %s598_s22, %s598_s22, %s599_s23  }
  0x22   : > { %p174_p13 = scmp.lt.s32.totalorder %s595_s17, 3 }
  0x24   : > { %p175_p2 = pnand %p409_p1, %p174_p13 }
  0x25   : > { %s707_s28 = sand.u32 (!%p175_p2), 1, %s579_s13  }
  0x26   : > { %178 = sbr.rel (%p175_p2) target bundleno = 264 (0x108), region = 32  ;;  %s410_s29 = sshll.u32 (!%p175_p2), %s707_s28, 6 }
  0x27   : > { %s181_s30 = scalar_lea.sflag (!%p175_p2), [#allocation3], %s707_s28  ;;  %s184_s4 = scalar_lea.vmem (!%p175_p2), [#allocation2], %s410_s29 }
  0x2b   : > { %566 = dma.done.wait (%p670_p8), %s181_s30, 1024  }
  0x2c   : > { %568 = vsyncadd (%p670_p8), %s181_s30, 4294966272  ;;  %v600_v0 = vmov 0.0   ;;  %v601_v1 = vmov 0   ;;  %v216_v2 = vld [vmem:[%s184_s4 + $0x38] sm:$0xff]  ;;  %v215_v3 = vld [vmem:[%s184_s4 + $0x30] sm:$0xff]  ;;  %vm224_vm0 = vcmask 261120  }
  0x2d   : > { %292 = vmatprep.mubr.f32.mxu0 %v600_v0  ;;  %486 = vset.pattern.permute.xlu0 %v601_v1  ;;  %v214_v4 = vld [vmem:[%s184_s4 + $0x28] sm:$0xff]  ;;  %v213_v5 = vld [vmem:[%s184_s4 + $0x20] sm:$0xff]  ;;  %v212_v6 = vld [vmem:[%s184_s4 + $0x18] sm:$0xff]  ;;  %s411_s8 = sshll.u32 %s707_s28, 4  ;;  %s419_s9 = sshll.u32 %s587_s15, 8 }
  0x2e   : > { %252 = vmatprep.subr.mxu0 %v216_v2  ;;  %v211_v7 = vld [vmem:[%s184_s4 + $0x10] sm:$0xff]  ;;  %v218_v8 = vld [vmem:[%s764_s2] sm:$0xff]  ;;  %v210_v9 = vld [vmem:[%s184_s4 + $0x8] sm:$0xff]  ;;  %s206_s10 = scalar_lea.vmem [#allocation5], %s411_s8  ;;  %s316_s21 = scalar_lea.hbm %s765_s3, %s419_s9 }
  0x2f   : > { %253 = vmatpush1.msra.mxu0 %v215_v3  ;;  %221 = vperm.xlu0 %486, %v218_v8   ;;  %v209_v10 = vld [vmem:[%s184_s4] sm:$0xff]  ;;  %s318_s11 = sshll.u32 %s206_s10, 4  ;;  %s302_s22 = scalar_lea.sflag [#allocation4], %s707_s28  ;;  %s319_s11 = int_to_ptr.vmem [resolvable:$true] %s318_s11 }
  0x30   : > { %254 = vmatprep.subr.mxu0 %v214_v4  ;;  %v217_v11 = vld [vmem:[%s763_s1] sm:$0xff]  ;;  %s515_s23 = scalar_lea.vmem %s319_s11, 256  ;;  %s602_s29 = smov [#allocation5]  }
  0x31   : > { %255 = vmatpush1.msra.mxu0 %v213_v5  ;;  %p516_p8 = scmp.ne.s32.totalorder %s319_s11, %s515_s23  ;;  %s519_s15 = sshll.u32 %s602_s29, 4  ;;  %s520_s15 = int_to_ptr.vmem [resolvable:$false] %s519_s15 }
  0x32   : > { %256 = vmatprep.subr.mxu0 %v212_v6  ;;  %s521_s30 = scalar_lea.vmem %s520_s15, 512  ;;  %p522_p1 = scmp.lt.s32.totalorder %s319_s11, %s520_s15 }
  0x33   : > { %257 = vmatpush1.msra.mxu0 %v211_v7  ;;  %p517_p12 = pnand %p516_p8, %p674_p9  ;;  %p523_p3 = scmp.lt.s32.totalorder %s521_s30, %s515_s23 }
  0x34   : > { %258 = vmatprep.subr.mxu0 %v210_v9 }
  0x35   : > { %259 = vmatpush1.msra.mxu0 %v209_v10  ;;  %p518_p0 = pneg %p517_p12  ;;  %p524_p5 = por %p523_p3, %p522_p1 }
  0x36   : > { %412 = vmatmul.mubr.msk.f32.vlgmr.msra.gmra.mxu0 %vm224_vm0, %v217_v11 }
  0x37   : > { %p525_p6 = pnand %p524_p5, %p518_p0 }
  0xaa   : > { %v222_v12 = vpop.permute.xlu0 %221 }
  0xf6   : > { %v294_v13 = vpop.f32.mrf.mxu0 }
  0xf7   : > { %v295_v14 = vadd.f32 %v294_v13, %v222_v12 }
  0xf8   : > { %v296_v15 = vpop.f32.mrf.mxu0 }
  0xf9   : > { %299 = vst [vmem:[%s206_s10] sm:$0xff] %v295_v14  ;;  %v297_v16 = vadd.f32 %v296_v15, %v222_v12 }
  0xfb   : > { %300 = vst [vmem:[%s206_s10 + $0x8] sm:$0xff] %v297_v16 }
  0xfc   : > { %528 = shalt.err (!%p525_p6)
}
  0xfd   : > { %s529_s4 = scalar_lea.hbm %s316_s21, 256  ;;  %s533_s6 = scalar_lea.hbm %s765_s3, 512 }
  0xfe   : > { %p530_p7 = scmp.ne.s32.totalorder %s316_s21, %s529_s4  ;;  %p534_p13 = scmp.lt.s32.totalorder %s316_s21, %s765_s3 }
  0xff   : > { %p535_p2 = scmp.lt.s32.totalorder %s533_s6, %s529_s4 }
 0x100   : > { %p531_p10 = pnand %p530_p7, %p674_p9 }
 0x101   : > { %p536_p8 = por %p535_p2, %p534_p13 }
 0x102   : > { %p532_p4 = pneg %p531_p10 }
 0x104   : > { %p537_p12 = pnand %p536_p8, %p532_p4 }
 0x106   : > { %540 = shalt.err (!%p537_p12)
}
 0x107   : > { %422 = dma.vmem_to_hbm [thread:$0]  (%p674_p9), %s319_s11, 256, %s316_s21, %s302_s22  }
 0x108 PF: > { %s330_s8 = sand.u32 1, %s575_s12   ;;  %p771_p0 = scmp.ge.s32.totalorder %s595_s17, 2 }
 0x109   : > { %s331_s9 = scalar_lea.sflag [#allocation4], %s330_s8 }
 0x10a   : > { %p429_p1 = pnand %p771_p0, %p681_p11 }
 0x10c   : > { %p430_p3 = pneg %p429_p1 }
 0x10e   : > { %570 = dma.done.wait (%p430_p3), %s331_s9, 256  }
 0x10f   : > { %572 = vsyncadd (%p430_p3), %s331_s9, 4294967040  ;;  %s19_s17 = sadd.s32 1, %s595_s17   ;;  %s772_s12 = smov %s579_s13 }
 0x110   : > { %p16_p5 = scmp.ge.s32.totalorder %s19_s17, 4   ;;  %s773_s13 = smov %s583_s14 }
 0x111   : > { %s774_s14 = smov %s679_s26  ;;  %s775_s15 = smov %s591_s16 }
 0x112   : > { %s776_s16 = smov %s778_s20  ;;  %18 = sbr.rel (!%p16_p5) target bundleno = 6 (0x6), region = 77 }
 0x117   :  { %336 = vsyncpa [#allocation3], 1 }
 0x118   :  { %338 = vsyncpa [#allocation3 + $0x1], 1 }
 0x119   :  { %339 = vsyncpa [#allocation4], 1 }
 0x11a   :  { %341 = vsyncpa [#allocation4 + $0x1], 1 }

</bundles_post_ra>
